<compile_context>
chip_gen: v6e
topology: v6e:2x2x1
jax: 0.10.0
libtpu: 0.0.40
codegen_flags: <defaults>
</compile_context>

<pallas_src>
import jax
import jax.numpy as jnp
import numpy as np
from jax.experimental import pallas as pl
from jax.experimental.pallas import tpu as pltpu


def _round_up(x: int, m: int) -> int:
    return ((x + m - 1) // m) * m


def _decoder_matmul_kernel(x_ref, w_ref, bias_ref, o_ref):
    # x_ref : (TM, TK) VMEM   w_ref : (TK, TN) VMEM
    # bias  : (1,)     SMEM   o_ref : (TM, TN) VMEM (f32, revisited across k)
    @pl.when(pl.program_id(2) == 0)
    def _():
        o_ref[...] = jnp.zeros_like(o_ref) + bias_ref[0]

    o_ref[...] += jnp.dot(x_ref[...], w_ref[...], preferred_element_type=jnp.float32)


def decoder_forward(spec, weight, bias, *, stride, padding=0, output_padding=0):
    """Forward pass of Decoder: spec (..., n_filters, T) -> wav (..., L_out)."""
    C, _, K = weight.shape                       # ConvTranspose1d weight: (C_in, 1, K)
    *lead, c_in, T = spec.shape
    assert c_in == C, "last-but-one dim of spec must equal n_filters"
    L_out = (T - 1) * stride - 2 * padding + K + output_padding
    assert L_out > 0

    B = 1
    for d in lead:
        B *= d

    r = (K - 1) // stride + 1                    # overlapping frames per output row
    G = max(1, -(-128 // stride))                # output rows per chunk -> >=128 lanes/chunk
    D = G + r - 1                                # input frames feeding one chunk
    P = padding + L_out                          # un-cropped samples needed
    M_total = -(-P // stride)                    # output rows needed
    NI = -(-M_total // G)                        # chunks per batch element

    # ---- input windows X[b, i, w, c] = spec[b, c, i*G + w - (r-1)]  (zero-padded) ----
    spec_t = jnp.swapaxes(spec.reshape(B, C, T).astype(jnp.float32), 1, 2)   # (B, T, C)
    left = r - 1
    right = max(0, NI * G - T)
    spec_pad = jnp.pad(spec_t, ((0, 0), (left, right), (0, 0)))
    base = spec_pad[:, : NI * G, :].reshape(B, NI, G, C)                     # w in [0, G)
    extras = [spec_pad[:, G + d :: G, :][:, :NI, None, :] for d in range(r - 1)]
    X = jnp.concatenate([base] + extras, axis=2) if extras else base         # (B, NI, D, C)
    Xf = X.reshape(B * NI, D * C)

    # ---- block-banded weight Wmat[(w, c), (g, s)] = W[c, (g + r - 1 - w)*stride + s] ----
    w2 = weight[:, 0, :].astype(jnp.float32)                                 # (C, K)
    w_ids = jnp.arange(D)[:, None]
    g_ids = jnp.arange(G)[None, :]
    j = g_ids + (r - 1) - w_ids                                              # (D, G)
    k_idx = j[:, :, None] * stride + jnp.arange(stride)[None, None, :]       # (D, G, stride)
    valid = (j[:, :, None] >= 0) & (k_idx >= 0) & (k_idx < K)
    k_cl = jnp.clip(k_idx, 0, K - 1)
    Wm = jnp.where(valid[:, None, :, :],
                   jnp.transpose(w2[:, k_cl], (1, 0, 2, 3)), 0.0)            # (D, C, G, stride)
    Wm = Wm.reshape(D * C, G * stride)

    # ---- pad to MXU/lane-friendly tiles ----
    M = B * NI
    CD = D * C
    N_cols = G * stride

    if M <= 128:
        TM = _round_up(max(M, 1), 8)
    elif M >= 512:
        TM = 512
    elif M >= 256:
        TM = 256
    else:
        TM = 128
    Mp = _round_up(M, TM)

    if CD <= 512:
        TK = _round_up(CD, 128)
        CDp = TK
    else:
        TK = 512
        CDp = _round_up(CD, 512)

    Np = _round_up(N_cols, 128)
    if Np <= 512:
        TN = Np
    elif Np % 512 == 0:
        TN = 512
    elif Np % 256 == 0:
        TN = 256
    else:
        TN = 128

    x_p = jnp.zeros((Mp, CDp), jnp.float32).at[:M, :CD].set(Xf)
    w_p = jnp.zeros((CDp, Np), jnp.float32).at[:CD, :N_cols].set(Wm)
    bias_arr = jnp.asarray(bias, jnp.float32).reshape(1)

    grid = (Mp // TM, Np // TN, CDp // TK)
    cost = pl.CostEstimate(
        flops=2 * Mp * CDp * Np,
        transcendentals=0,
        bytes_accessed=4 * (Mp * CDp + CDp * Np + Mp * Np),
    )

    out = pl.pallas_call(
        _decoder_matmul_kernel,
        out_shape=jax.ShapeDtypeStruct((Mp, Np), jnp.float32),
        grid=grid,
        in_specs=[
            pl.BlockSpec((TM, TK), lambda i, jn, k: (i, k)),          # input windows
            pl.BlockSpec((TK, TN), lambda i, jn, k: (k, jn)),         # block-banded weight
            pl.BlockSpec(memory_space=pltpu.MemorySpace.SMEM),        # scalar bias
        ],
        out_specs=pl.BlockSpec((TM, TN), lambda i, jn, k: (i, jn)),
        compiler_params=pltpu.CompilerParams(
            dimension_semantics=("parallel", "parallel", "arbitrary"),
        ),
        cost_estimate=cost,
    )(x_p, w_p, bias_arr)

    full = out[:M, :N_cols].reshape(B, NI * N_cols)                   # (B, >= padding+L_out)
    wav = full[:, padding : padding + L_out]                          # crop (handles output_padding)
    return wav.reshape(tuple(lead) + (L_out,)).astype(spec.dtype)


if __name__ == "__main__":
    key = jax.random.PRNGKey(0)
    n_filters, kernel_size = 16, 16
    stride = kernel_size // 2            # default stride in _EncDec
    padding, output_padding = 2, 1
    T = 12
    lead = (2, 3)                        # spec has arbitrary leading dims

    k1, k2, k3 = jax.random.split(key, 3)
    # xavier_normal_ on weight of shape (C, 1, K): fan_in=K, fan_out=C*K
    std = (2.0 / (kernel_size + n_filters * kernel_size)) ** 0.5
    weight = std * jax.random.normal(k1, (n_filters, 1, kernel_size), jnp.float32)
    bound = (1.0 / (n_filters * kernel_size)) ** 0.5   # default ConvTranspose1d bias init
    bias = jax.random.uniform(k2, (1,), jnp.float32, -bound, bound)
    spec = jax.random.normal(k3, lead + (n_filters, T), jnp.float32)

    wav = decoder_forward(
        spec, weight, bias,
        stride=stride, padding=padding, output_padding=output_padding,
    )
    jax.block_until_ready(wav)

    # numpy reference (direct ConvTranspose1d definition) for a sanity check
    x_np = np.asarray(spec).reshape(-1, n_filters, T)
    w_np = np.asarray(weight)
    b_np = float(np.asarray(bias)[0])
    L_out = (T - 1) * stride - 2 * padding + kernel_size + output_padding
    ref = np.full((x_np.shape[0], L_out), b_np, dtype=np.float32)
    for bi in range(x_np.shape[0]):
        for t in range(T):
            for kk in range(kernel_size):
                l = t * stride + kk - padding
                if 0 <= l < L_out:
                    ref[bi, l] += float(np.dot(x_np[bi, :, t], w_np[:, 0, kk]))
    ref = ref.reshape(lead + (L_out,))

    assert wav.shape == lead + (L_out,)
    np.testing.assert_allclose(np.asarray(wav), ref, rtol=1e-4, atol=1e-4)
    print("KERNEL_OK")
</pallas_src>

<mosaic_0001>
module attributes {stable_mosaic.version = 11 : i64} {
  func.func @_decoder_matmul_kernel(%arg0: i32, %arg1: i32, %arg2: i32, %arg3: memref<8x384xf32, #tpu.memory_space<vmem>>, %arg4: memref<384x128xf32, #tpu.memory_space<vmem>>, %arg5: memref<1xf32, #tpu.memory_space<smem>>, %arg6: memref<8x128xf32, #tpu.memory_space<vmem>>) attributes {dimension_semantics = [#tpu.dimension_semantics<parallel>, #tpu.dimension_semantics<parallel>, #tpu.dimension_semantics<arbitrary>], iteration_bounds = array<i64: 1, 1, 1>, scalar_prefetch = 0 : i64, scratch_operands = 0 : i64, tpu.core_type = #tpu.core_type<tc>, window_params = [{transform_indices = @transform_0, window_bounds = array<i64: 8, 384>}, {transform_indices = @transform_1, window_bounds = array<i64: 384, 128>}, {transform_indices = @transform_2, window_bounds = array<i64: 1>}, {transform_indices = @transform_3, window_bounds = array<i64: 8, 128>}]} {
    %c0_i32 = arith.constant 0 : i32
    %0 = arith.cmpi eq, %arg2, %c0_i32 : i32
    %1 = arith.extui %0 : i1 to i32
    %c0_i32_0 = arith.constant 0 : i32
    %2 = arith.cmpi ne, %1, %c0_i32_0 : i32
    scf.if %2 {
      %cst_8 = arith.constant 0.000000e+00 : f32
      %9 = vector.broadcast %cst_8 : f32 to vector<8x128xf32>
      %c0_9 = arith.constant 0 : index
      %10 = memref.load %arg5[%c0_9] : memref<1xf32, #tpu.memory_space<smem>>
      %11 = vector.broadcast %10 : f32 to vector<8x128xf32>
      %12 = arith.addf %9, %11 : vector<8x128xf32>
      %c0_10 = arith.constant 0 : index
      %c0_11 = arith.constant 0 : index
      %13 = vector.load %arg6[%c0_10, %c0_11] : memref<8x128xf32, #tpu.memory_space<vmem>>, vector<8x128xf32>
      tpu.vector_store %arg6[%c0_10, %c0_11], %12 {strides = array<i32>} : memref<8x128xf32, #tpu.memory_space<vmem>>, vector<8x128xf32>,
    } else {
    }
    %c0 = arith.constant 0 : index
    %c0_1 = arith.constant 0 : index
    %3 = vector.load %arg6[%c0, %c0_1] : memref<8x128xf32, #tpu.memory_space<vmem>>, vector<8x128xf32>
    %c0_2 = arith.constant 0 : index
    %c0_3 = arith.constant 0 : index
    %4 = vector.load %arg3[%c0_2, %c0_3] : memref<8x384xf32, #tpu.memory_space<vmem>>, vector<8x384xf32>
    %c0_4 = arith.constant 0 : index
    %c0_5 = arith.constant 0 : index
    %5 = vector.load %arg4[%c0_4, %c0_5] : memref<384x128xf32, #tpu.memory_space<vmem>>, vector<384x128xf32>
    %cst = arith.constant dense<0.000000e+00> : vector<8x128xf32>
    %6 = tpu.matmul %4, %5, %cst {dimension_numbers = #tpu.dot_dimension_numbers<[1], [0], [0], [1], [0, 0, 1, 1], [], []>} : vector<8x384xf32>, vector<384x128xf32>, vector<8x128xf32> -> vector<8x128xf32>
    %7 = arith.addf %3, %6 : vector<8x128xf32>
    %c0_6 = arith.constant 0 : index
    %c0_7 = arith.constant 0 : index
    %8 = vector.load %arg6[%c0_6, %c0_7] : memref<8x128xf32, #tpu.memory_space<vmem>>, vector<8x128xf32>
    tpu.vector_store %arg6[%c0_6, %c0_7], %7 {strides = array<i32>} : memref<8x128xf32, #tpu.memory_space<vmem>>, vector<8x128xf32>,
    return
  }
  func.func @transform_0(%arg0: i32, %arg1: i32, %arg2: i32) -> (i32, i32) {
    %c0_i32 = arith.constant 0 : i32
    return %arg0, %arg2 : i32, i32
  }
  func.func @transform_1(%arg0: i32, %arg1: i32, %arg2: i32) -> (i32, i32) {
    %c0_i32 = arith.constant 0 : i32
    return %arg2, %arg1 : i32, i32
  }
  func.func @transform_2(%arg0: i32, %arg1: i32, %arg2: i32) -> i32 {
    %c0_i32 = arith.constant 0 : i32
    %c0_i32_0 = arith.constant 0 : i32
    return %c0_i32 : i32
  }
  func.func @transform_3(%arg0: i32, %arg1: i32, %arg2: i32) -> (i32, i32) {
    %c0_i32 = arith.constant 0 : i32
    return %arg0, %arg1 : i32, i32
  }
}

</mosaic_0001>

<bundles_post_ra>
// kernel: tpu_custom_call.1
= control target key start
LH: loop header
LB: loop body
LE: loop exit
PB: predicated region body
PF: predicated region fallthrough
CT: control target
= control target key end

     0   :  { %9 = vsyncpa [#allocation4], 0  ;;  %s476_s0 = inlined_call_operand.hbm [shape: f32[8,384], index: 0, kind: input, shape index: {}]   ;;  %s477_s1 = inlined_call_operand.hbm [shape: f32[384,128], index: 1, kind: input, shape index: {}]   ;;  %s478_s2 = inlined_call_operand.<no memory space> [shape: f32[1], index: 2, kind: input, shape index: {}]   ;;  %s479_s3 = inlined_call_operand.hbm [shape: f32[8,128], index: 3, kind: output, shape index: {}]  }
   0x1   :  { %10 = vsyncpa [#allocation7], 0 }
   0x2   :  { %11 = vsyncpa [#allocation5], 0  ;;  %s420_s12 = smov [#allocation3]   ;;  %s421_s14 = smov [#allocation6]  }
   0x3   :  { %s18_s13 = sshll.u32 %s420_s12, 4  ;;  %s27_s15 = sshll.u32 %s421_s14, 4  ;;  %s19_s13 = int_to_ptr.vmem [resolvable:$true] %s18_s13  ;;  %s28_s15 = int_to_ptr.vmem [resolvable:$true] %s27_s15 }
   0x4   :  { %s362_s16 = scalar_lea.vmem %s19_s13, 384  ;;  %p367_p1 = scmp.lt.s32.totalorder %s19_s13, %s19_s13 }
   0x5   :  { %p363_p0 = scmp.ne.s32.totalorder %s19_s13, %s362_s16  ;;  %p368_p2 = scmp.lt.s32.totalorder %s362_s16, %s362_s16 }
   0x7   :  { %p369_p3 = por %p368_p2, %p367_p1 }
   0x9   :  { %p370_p4 = pnand %p369_p3, %p363_p0 }
   0xb   :  { %373 = shalt.err (!%p370_p4)
}
   0xc   :  { %21 = dma.hbm_to_vmem [thread:$0]  %s476_s0, 384, %s19_s13, [#allocation4]  }
   0xd   :  { %s382_s19 = scalar_lea.vmem %s28_s15, 6144  ;;  %p387_p6 = scmp.lt.s32.totalorder %s28_s15, %s28_s15 }
   0xe   :  { %p383_p5 = scmp.ne.s32.totalorder %s28_s15, %s382_s19  ;;  %p388_p7 = scmp.lt.s32.totalorder %s382_s19, %s382_s19 }
  0x10   :  { %p389_p8 = por %p388_p7, %p387_p6 }
  0x12   :  { %p390_p9 = pnand %p389_p8, %p383_p5 }
  0x14   :  { %393 = shalt.err (!%p390_p9)
}
  0x15   :  { %s422_s20 = smov 128   ;;  %s423_s21 = smov 8  }
  0x16   :  { %33 = dma.hbm_to_vmem [thread:$0]  %s477_s1, 6144, %s28_s15, [#allocation7], %s422_s20, %s422_s20, %s423_s21  }
  0x17   :  { %414 = dma.done.wait [#allocation4], 384  }
  0x18   :  { %415 = vsyncadd [#allocation4], 4294966912 }
  0x19   :  { %416 = dma.done.wait [#allocation7], 6144  }
  0x1a   :  { %417 = vsyncadd [#allocation7], 4294961152  ;;  %v424_v0 = vmov 0.0   ;;  %vm425_vm0 = vmmov 0   ;;  %v85_v1 = vld [vmem:[#allocation6 + $0xf8] sm:$0xff]  ;;  %v84_v3 = vld [vmem:[#allocation6 + $0xf0] sm:$0xff]  ;;  %v47_v57 = vstv %s478_s2 }
  0x1b   :  { %312 = vmatprep.subr.mxu1 %v424_v0  ;;  %344 = vmatprep.mubr.msk.f32.mxu1 %vm425_vm0, %v424_v0  ;;  %v69_v2 = vld [vmem:[#allocation6 + $0x78] sm:$0xff]  ;;  %v68_v4 = vld [vmem:[#allocation6 + $0x70] sm:$0xff]  ;;  %v83_v6 = vld [vmem:[#allocation6 + $0xe8] sm:$0xff]  ;;  %s426_s24 = smov [#allocation8]  }
  0x1c   :  { %260 = vmatprep.subr.mxu0 %v85_v1  ;;  %v101_v5 = vld [vmem:[#allocation6 + $0x178] sm:$0xff]  ;;  %v100_v7 = vld [vmem:[#allocation6 + $0x170] sm:$0xff]  ;;  %v67_v8 = vld [vmem:[#allocation6 + $0x68] sm:$0xff]  ;;  %s250_s25 = sshll.u32 %s426_s24, 4  ;;  %s251_s25 = int_to_ptr.vmem [resolvable:$true] %s250_s25 }
  0x1d   :  { %261 = vmatpush3.msra.mxu0 %v69_v2  ;;  %313 = vmatpush3.msra.mxu1 %v101_v5  ;;  %v99_v9 = vld [vmem:[#allocation6 + $0x168] sm:$0xff]  ;;  %v82_v10 = vld [vmem:[#allocation6 + $0xe0] sm:$0xff]  ;;  %v81_v13 = vld [vmem:[#allocation6 + $0xd8] sm:$0xff]  ;;  %s394_s26 = scalar_lea.vmem %s251_s25, 128  ;;  %p399_p11 = scmp.lt.s32.totalorder %s251_s25, %s251_s25 }
  0x1e   :  { %262 = vmatprep.subr.mxu0 %v84_v3  ;;  %314 = vmatprep.subr.mxu1 %v424_v0  ;;  %v66_v11 = vld [vmem:[#allocation6 + $0x60] sm:$0xff]  ;;  %v65_v14 = vld [vmem:[#allocation6 + $0x58] sm:$0xff]  ;;  %v80_v16 = vld [vmem:[#allocation6 + $0xd0] sm:$0xff]  ;;  %p395_p10 = scmp.ne.s32.totalorder %s251_s25, %s394_s26  ;;  %p400_p12 = scmp.lt.s32.totalorder %s394_s26, %s394_s26 }
  0x1f   :  { %263 = vmatpush3.msra.mxu0 %v68_v4  ;;  %315 = vmatpush3.msra.mxu1 %v100_v7  ;;  %v98_v12 = vld [vmem:[#allocation6 + $0x160] sm:$0xff]  ;;  %v97_v15 = vld [vmem:[#allocation6 + $0x158] sm:$0xff]  ;;  %v64_v17 = vld [vmem:[#allocation6 + $0x50] sm:$0xff] }
  0x20   :  { %264 = vmatprep.subr.mxu0 %v83_v6  ;;  %316 = vmatprep.subr.mxu1 %v424_v0  ;;  %v96_v18 = vld [vmem:[#allocation6 + $0x150] sm:$0xff]  ;;  %v79_v19 = vld [vmem:[#allocation6 + $0xc8] sm:$0xff]  ;;  %v78_v22 = vld [vmem:[#allocation6 + $0xc0] sm:$0xff]  ;;  %p401_p13 = por %p400_p12, %p399_p11 }
  0x21   :  { %265 = vmatpush3.msra.mxu0 %v67_v8  ;;  %317 = vmatpush3.msra.mxu1 %v99_v9  ;;  %v63_v20 = vld [vmem:[#allocation6 + $0x48] sm:$0xff]  ;;  %v62_v23 = vld [vmem:[#allocation6 + $0x40] sm:$0xff]  ;;  %v77_v25 = vld [vmem:[#allocation6 + $0xb8] sm:$0xff] }
  0x22   :  { %266 = vmatprep.subr.mxu0 %v82_v10  ;;  %318 = vmatprep.subr.mxu1 %v424_v0  ;;  %v95_v21 = vld [vmem:[#allocation6 + $0x148] sm:$0xff]  ;;  %v94_v24 = vld [vmem:[#allocation6 + $0x140] sm:$0xff]  ;;  %v61_v26 = vld [vmem:[#allocation6 + $0x38] sm:$0xff]  ;;  %p402_p0 = pnand %p401_p13, %p395_p10 }
  0x23   :  { %267 = vmatpush3.msra.mxu0 %v66_v11  ;;  %319 = vmatpush3.msra.mxu1 %v98_v12  ;;  %v93_v27 = vld [vmem:[#allocation6 + $0x138] sm:$0xff]  ;;  %v76_v28 = vld [vmem:[#allocation6 + $0xb0] sm:$0xff]  ;;  %v75_v31 = vld [vmem:[#allocation6 + $0xa8] sm:$0xff] }
  0x24   :  { %268 = vmatprep.subr.mxu0 %v81_v13  ;;  %320 = vmatprep.subr.mxu1 %v424_v0  ;;  %v60_v29 = vld [vmem:[#allocation6 + $0x30] sm:$0xff]  ;;  %v59_v32 = vld [vmem:[#allocation6 + $0x28] sm:$0xff]  ;;  %v74_v34 = vld [vmem:[#allocation6 + $0xa0] sm:$0xff] }
  0x25   :  { %269 = vmatpush3.msra.mxu0 %v65_v14  ;;  %321 = vmatpush3.msra.mxu1 %v97_v15  ;;  %v92_v30 = vld [vmem:[#allocation6 + $0x130] sm:$0xff]  ;;  %v91_v33 = vld [vmem:[#allocation6 + $0x128] sm:$0xff]  ;;  %v58_v35 = vld [vmem:[#allocation6 + $0x20] sm:$0xff] }
  0x26   :  { %270 = vmatprep.subr.mxu0 %v80_v16  ;;  %322 = vmatprep.subr.mxu1 %v424_v0  ;;  %v90_v36 = vld [vmem:[#allocation6 + $0x120] sm:$0xff]  ;;  %v73_v37 = vld [vmem:[#allocation6 + $0x98] sm:$0xff]  ;;  %v72_v40 = vld [vmem:[#allocation6 + $0x90] sm:$0xff] }
  0x27   :  { %271 = vmatpush3.msra.mxu0 %v64_v17  ;;  %323 = vmatpush3.msra.mxu1 %v96_v18  ;;  %v57_v38 = vld [vmem:[#allocation6 + $0x18] sm:$0xff]  ;;  %v56_v41 = vld [vmem:[#allocation6 + $0x10] sm:$0xff]  ;;  %v71_v43 = vld [vmem:[#allocation6 + $0x88] sm:$0xff] }
  0x28   :  { %272 = vmatprep.subr.mxu0 %v79_v19  ;;  %324 = vmatprep.subr.mxu1 %v424_v0  ;;  %v89_v39 = vld [vmem:[#allocation6 + $0x118] sm:$0xff]  ;;  %v88_v42 = vld [vmem:[#allocation6 + $0x110] sm:$0xff]  ;;  %v55_v44 = vld [vmem:[#allocation6 + $0x8] sm:$0xff] }
  0x29   :  { %273 = vmatpush3.msra.mxu0 %v63_v20  ;;  %325 = vmatpush3.msra.mxu1 %v95_v21  ;;  %v52_v45 = vld [vmem:[#allocation3 + $0x8] sm:$0xff]  ;;  %v70_v46 = vld [vmem:[#allocation6 + $0x80] sm:$0xff]  ;;  %v87_v47 = vld [vmem:[#allocation6 + $0x108] sm:$0xff] }
  0x2a   :  { %274 = vmatprep.subr.mxu0 %v78_v22  ;;  %326 = vmatprep.subr.mxu1 %v424_v0  ;;  %v54_v48 = vld [vmem:[#allocation6] sm:$0xff]  ;;  %v51_v49 = vld [vmem:[#allocation3] sm:$0xff]  ;;  %v53_v51 = vld [vmem:[#allocation3 + $0x10] sm:$0xff] }
  0x2b   :  { %275 = vmatpush3.msra.mxu0 %v62_v23  ;;  %327 = vmatpush3.msra.mxu1 %v94_v24  ;;  %v86_v50 = vld [vmem:[#allocation6 + $0x100] sm:$0xff] }
  0x2c   :  { %276 = vmatprep.subr.mxu0 %v77_v25  ;;  %328 = vmatprep.subr.mxu1 %v424_v0 }
  0x2d   :  { %277 = vmatpush3.msra.mxu0 %v61_v26  ;;  %329 = vmatpush3.msra.mxu1 %v93_v27 }
  0x2e   :  { %278 = vmatprep.subr.mxu0 %v76_v28  ;;  %330 = vmatprep.subr.mxu1 %v424_v0 }
  0x2f   :  { %279 = vmatpush3.msra.mxu0 %v60_v29  ;;  %331 = vmatpush3.msra.mxu1 %v92_v30 }
  0x30   :  { %280 = vmatprep.subr.mxu0 %v75_v31  ;;  %332 = vmatprep.subr.mxu1 %v424_v0 }
  0x31   :  { %281 = vmatpush3.msra.mxu0 %v59_v32  ;;  %333 = vmatpush3.msra.mxu1 %v91_v33 }
  0x32   :  { %282 = vmatprep.subr.mxu0 %v74_v34  ;;  %334 = vmatprep.subr.mxu1 %v424_v0 }
  0x33   :  { %283 = vmatpush3.msra.mxu0 %v58_v35  ;;  %335 = vmatpush3.msra.mxu1 %v90_v36 }
  0x34   :  { %284 = vmatprep.subr.mxu0 %v73_v37  ;;  %336 = vmatprep.subr.mxu1 %v424_v0 }
  0x35   :  { %285 = vmatpush3.msra.mxu0 %v57_v38  ;;  %337 = vmatpush3.msra.mxu1 %v89_v39 }
  0x36   :  { %286 = vmatprep.subr.mxu0 %v72_v40  ;;  %338 = vmatprep.subr.mxu1 %v424_v0 }
  0x37   :  { %287 = vmatpush3.msra.mxu0 %v56_v41  ;;  %339 = vmatpush3.msra.mxu1 %v88_v42 }
  0x38   :  { %288 = vmatprep.subr.mxu0 %v71_v43  ;;  %340 = vmatprep.subr.mxu1 %v424_v0 }
  0x39   :  { %289 = vmatpush3.msra.mxu0 %v55_v44  ;;  %166 = vmatprep.mubr.f32.mxu0 %v52_v45 }
  0x3a   :  { %290 = vmatprep.subr.mxu0 %v70_v46  ;;  %341 = vmatpush3.msra.mxu1 %v87_v47 }
  0x3b   :  { %291 = vmatpush3.msra.mxu0 %v54_v48  ;;  %342 = vmatprep.subr.mxu1 %v424_v0 }
  0x3c   :  { %167 = vmatmul.mubr.f32.vlgmr.msra.gmra.mxu0 %v51_v49  ;;  %343 = vmatpush3.msra.mxu1 %v86_v50 }
  0x3d   :  { %345 = vmatmul.mubr.f32.vlgmr.msra.gmra.mxu1 %v53_v51 }
  0xfc   :  { %v292_v52 = vpop.f32.mrf.mxu0 }
  0xfd   :  { %v238_v53 = vpop.f32.mrf.mxu1 }
  0xfe   :  { %v293_v54 = vpop.f32.mrf.mxu0 }
  0xff   :  { %v294_v55 = vadd.f32 %v293_v54, %v292_v52  ;;  %v346_v56 = vpop.f32.mrf.mxu1 }
 0x101   :  { %v239_v58 = vadd.f32 %v294_v55, %v238_v53 }
 0x103   :  { %v242_v59 = vadd.f32 %v239_v58, %v47_v57 }
 0x105   :  { %243 = vst [vmem:[#allocation8] sm:$0xff] %v242_v59 }
 0x106   :  { %405 = shalt.err (!%p402_p0)
}
 0x107   :  { %253 = dma.vmem_to_hbm [thread:$0]  %s251_s25, 128, %s479_s3, [#allocation5]  }
 0x108   :  { %418 = dma.done.wait [#allocation5], 128  }
 0x109   :  { %419 = vsyncadd [#allocation5], 4294967168 }
 0x10a   :  { %257 = vsyncpa [#allocation4], 1 }
 0x10b   :  { %258 = vsyncpa [#allocation7], 1 }
 0x10c   :  { %259 = vsyncpa [#allocation5], 1 }

</bundles_post_ra>
